<compile_context>
chip_gen: v6e
topology: v6e:2x2x1
jax: 0.10.0
libtpu: 0.0.40
codegen_flags: <defaults>
</compile_context>

<pallas_src>
import jax
import jax.numpy as jnp
from jax.experimental import pallas as pl
from jax.experimental.pallas import tpu as pltpu


# ----------------------------- model settings ------------------------------
BATCH = 2
NUM_EMBEDDINGS = 16   # patch_embeddings: (16x16 image) / (4x4 patch) = 16
EMBED_DIM = 32        # model_settings['num_hidden']


# --------------------------------- kernel -----------------------------------
def pos_embed_kernel(emb_ref, out_ref):
    # emb_ref: (L, D) full embedding table resident in VMEM.
    # out_ref: (B, L, D) — broadcast of the table across the batch axis.
    out_ref[...] = jnp.broadcast_to(emb_ref[...][None, :, :], out_ref.shape)


# --------------------------------- wrapper ----------------------------------
def positional_embedding_forward(x, emb_table):
    """x: (B, L, D) — only x.shape[0] is consumed (matches the PyTorch forward).
    emb_table: (num_embeddings, embedding_dim) = nn.Embedding.weight."""
    B = x.shape[0]
    L, D = emb_table.shape

    return pl.pallas_call(
        pos_embed_kernel,
        out_shape=jax.ShapeDtypeStruct((B, L, D), emb_table.dtype),
        # Gridless, full-array blocks: block_shape == array dims satisfies the
        # (8,128) rule and skips the pipeline prologue/epilogue entirely.
        in_specs=[pl.BlockSpec(memory_space=pltpu.MemorySpace.VMEM)],
        out_specs=pl.BlockSpec(memory_space=pltpu.MemorySpace.VMEM),
    )(emb_table)


# ----------------------------------- main ------------------------------------
if __name__ == "__main__":
    key = jax.random.PRNGKey(0)
    k_x, k_e = jax.random.split(key)

    # x as produced by the ViT patch-embedding stage: (B, num_patches, hidden).
    x = jax.random.normal(k_x, (BATCH, NUM_EMBEDDINGS, EMBED_DIM), dtype=jnp.float32)
    # nn.Embedding default init is N(0, 1).
    emb_table = jax.random.normal(k_e, (NUM_EMBEDDINGS, EMBED_DIM), dtype=jnp.float32)

    out = jax.jit(positional_embedding_forward)(x, emb_table)
    out = jax.block_until_ready(out)

    assert out.shape == (BATCH, NUM_EMBEDDINGS, EMBED_DIM)
    assert out.dtype == jnp.float32
    ref = jnp.broadcast_to(emb_table[None], (BATCH, NUM_EMBEDDINGS, EMBED_DIM))
    assert bool(jnp.allclose(out, ref))
    print("KERNEL_OK")
</pallas_src>

<mosaic_0001>
module attributes {stable_mosaic.version = 11 : i64} {
  func.func @pos_embed_kernel(%arg0: memref<16x32xf32, #tpu.memory_space<vmem>>, %arg1: memref<2x16x32xf32, #tpu.memory_space<vmem>>) attributes {dimension_semantics = [], scalar_prefetch = 0 : i64, scratch_operands = 0 : i64, tpu.core_type = #tpu.core_type<tc>} {
    %c0 = arith.constant 0 : index
    %c0_0 = arith.constant 0 : index
    %0 = vector.load %arg0[%c0, %c0_0] : memref<16x32xf32, #tpu.memory_space<vmem>>, vector<16x32xf32>
    %1 = vector.shape_cast %0 : vector<16x32xf32> to vector<1x16x32xf32>
    %2 = vector.shape_cast %1 : vector<1x16x32xf32> to vector<1x16x32xf32>
    %3 = vector.broadcast %2 : vector<1x16x32xf32> to vector<2x16x32xf32>
    %c0_1 = arith.constant 0 : index
    %c0_2 = arith.constant 0 : index
    %c0_3 = arith.constant 0 : index
    %4 = vector.load %arg1[%c0_1, %c0_2, %c0_3] : memref<2x16x32xf32, #tpu.memory_space<vmem>>, vector<2x16x32xf32>
    tpu.vector_store %arg1[%c0_1, %c0_2, %c0_3], %3 {strides = array<i32>} : memref<2x16x32xf32, #tpu.memory_space<vmem>>, vector<2x16x32xf32>,
    return
  }
}

</mosaic_0001>

<bundles_post_ra>
// kernel: positional_embedding_forward.1
= control target key start
LH: loop header
LB: loop body
LE: loop exit
PB: predicated region body
PF: predicated region fallthrough
CT: control target
= control target key end

     0   :  { %6 = vsyncpa [#allocation3], 0  ;;  %s115_s0 = inlined_call_operand.hbm [shape: f32[16,32], index: 0, kind: input, shape index: {}]   ;;  %s116_s1 = inlined_call_operand.hbm [shape: f32[2,16,32], index: 1, kind: output, shape index: {}]  }
   0x1   :  { %7 = vsyncpa [#allocation4], 0  ;;  %s95_s6 = smov [#allocation2]  }
   0x2   :  { %s13_s7 = sshll.u32 %s95_s6, 4  ;;  %s14_s7 = int_to_ptr.vmem [resolvable:$true] %s13_s7 }
   0x3   :  { %s59_s8 = scalar_lea.vmem %s14_s7, 256  ;;  %p64_p1 = scmp.lt.s32.totalorder %s14_s7, %s14_s7 }
   0x4   :  { %p60_p0 = scmp.ne.s32.totalorder %s14_s7, %s59_s8  ;;  %p65_p2 = scmp.lt.s32.totalorder %s59_s8, %s59_s8 }
   0x6   :  { %p66_p3 = por %p65_p2, %p64_p1 }
   0x8   :  { %p67_p4 = pnand %p66_p3, %p60_p0 }
   0xa   :  { %70 = shalt.err (!%p67_p4)
}
   0xb   :  { %s96_s9 = smov 128   ;;  %s97_s10 = smov 8  }
   0xc   :  { %19 = dma.hbm_to_vmem [thread:$0]  %s115_s0, 256, %s14_s7, [#allocation3], %s96_s9, %s96_s9, %s97_s10  }
   0xd   :  { %91 = dma.done.wait [#allocation3], 256  }
   0xe   :  { %92 = vsyncadd [#allocation3], 4294967040  ;;  %s98_s13 = smov [#allocation5]   ;;  %vm25_vm0 = vcmask 261120   ;;  %v23_v0 = vld [vmem:[#allocation2] sm:$0xff]  ;;  %v24_v1 = vld [vmem:[#allocation2 + $0x8] sm:$0xff] }
   0xf   :  { %s35_s14 = sshll.u32 %s98_s13, 4  ;;  %26 = vst.msk [vmem:[#allocation5] sm:$0xff] %vm25_vm0, %v23_v0  ;;  %28 = vst.msk [vmem:[#allocation5 + $0x10] sm:$0xff] %vm25_vm0, %v23_v0  ;;  %s36_s14 = int_to_ptr.vmem [resolvable:$true] %s35_s14 }
  0x10   :  { %27 = vst.msk [vmem:[#allocation5 + $0x8] sm:$0xff] %vm25_vm0, %v24_v1  ;;  %29 = vst.msk [vmem:[#allocation5 + $0x18] sm:$0xff] %vm25_vm0, %v24_v1  ;;  %s71_s15 = scalar_lea.vmem %s36_s14, 512  ;;  %p76_p6 = scmp.lt.s32.totalorder %s36_s14, %s36_s14 }
  0x11   :  { %p72_p5 = scmp.ne.s32.totalorder %s36_s14, %s71_s15  ;;  %p77_p7 = scmp.lt.s32.totalorder %s71_s15, %s71_s15 }
  0x13   :  { %p78_p8 = por %p77_p7, %p76_p6 }
  0x15   :  { %p79_p9 = pnand %p78_p8, %p72_p5 }
  0x17   :  { %82 = shalt.err (!%p79_p9)
}
  0x18   :  { %41 = dma.vmem_to_hbm [thread:$0]  %s36_s14, 512, %s116_s1, [#allocation4], %s96_s9, %s96_s9, %s97_s10  }
  0x19   :  { %93 = dma.done.wait [#allocation4], 512  }
  0x1a   :  { %94 = vsyncadd [#allocation4], 4294966784 }
  0x1b   :  { %45 = vsyncpa [#allocation3], 1 }
  0x1c   :  { %46 = vsyncpa [#allocation4], 1 }

</bundles_post_ra>
